<compile_context>
chip_gen: v7x
topology: tpu7x:2x2x1
jax: 0.10.0
libtpu: 0.0.40
codegen_flags: <defaults>
</compile_context>

<pallas_src>
import functools

import jax
import jax.numpy as jnp
from jax import lax
from jax.experimental import pallas as pl
from jax.experimental.pallas import tpu as pltpu

EPS = 1e-5  # nn.InstanceNorm2d default


def _round_up(x, m):
    return (x + m - 1) // m * m


def _tpu_budgets():
    """Return (vmem_capacity_bytes, has_two_tensorcores) for the local TPU generation."""
    vmem_cap = 64 << 20           # conservative default (v7x-sized)
    two_tc = True                 # conservative: assume batch-axis sharding helps
    kind = ""
    try:
        kind = jax.devices()[0].device_kind.lower()
    except Exception:
        pass
    try:
        vmem_cap = int(pltpu.get_tpu_info().vmem_capacity_bytes)
    except Exception:
        if "v5" in kind or "v6" in kind:
            vmem_cap = 128 << 20
    if "v5" in kind or "v6" in kind:
        two_tc = False            # single TensorCore per chip
    return vmem_cap, two_tc


# ---------------------------------------------------------------------------
# Pallas kernel: BB batch elements per grid step.
#   rhs  = 9 shifted (bf16) tap slices stacked on sublanes         (VMEM scratch)
#   acc  = W_stacked @ rhs                                         (single MXU matmul, f32)
#   y    = relu((acc - mean_hw) * rsqrt(var_hw + eps) * gamma + beta)   (biased variance)
# ---------------------------------------------------------------------------
def _attn_block_kernel(x_ref, w_ref, gamma_ref, beta_ref, valid_ref, out_ref, rhs_ref,
                       *, BB, Wp, HW, HWp_pad, C_in_pad):
    w = w_ref[...]                      # (C_out_pad, 9*C_in_pad) bf16
    gamma = gamma_ref[...]              # (C_out_pad, 1) f32
    beta = beta_ref[...]                # (C_out_pad, 1) f32
    valid = valid_ref[...]              # (1, HWp_pad)   f32 (1 on real output lanes)
    inv_n = 1.0 / float(HW)

    def compute(bb):
        x = x_ref[bb]                   # (C_in_pad, Lf_pad) bf16, flat (H+2)x(W+2) image
        # Pack the 9 tap slices into the stacked-K RHS (bf16, no masks needed: the
        # (W+2)-padded layout makes every tap a plain shifted window).
        for t in range(9):
            kh, kw = divmod(t, 3)
            s = kh * Wp + kw
            rhs_ref[t * C_in_pad:(t + 1) * C_in_pad, :] = x[:, s:s + HWp_pad]

        acc = jnp.dot(w, rhs_ref[...], preferred_element_type=jnp.float32)
        acc = acc * valid               # kill dead-column / past-end lanes before stats

        # instance norm over the spatial (lane) axis, biased variance
        mean = jnp.sum(acc, axis=1, keepdims=True) * inv_n
        d = (acc - mean) * valid
        var = jnp.sum(d * d, axis=1, keepdims=True) * inv_n
        scale = lax.rsqrt(var + EPS) * gamma
        y = d * scale + beta
        out_ref[bb] = jnp.maximum(y, 0.0).astype(out_ref.dtype)

    if BB == 1:
        compute(0)                      # static index, no loop machinery
    else:
        def body(bb, carry):
            compute(bb)
            return carry
        lax.fori_loop(0, BB, body, 0)   # real loop -> bounded live ranges


def _conv_norm_relu_pallas(x_flat, w_stk, gamma_p, beta_p, valid, *,
                           BB, Wp, HW, HWp_pad, vmem_cap):
    B, C_in_pad, Lf_pad = x_flat.shape
    C_out_pad = w_stk.shape[0]
    n_steps = B // BB

    kernel = functools.partial(_attn_block_kernel, BB=BB, Wp=Wp, HW=HW,
                               HWp_pad=HWp_pad, C_in_pad=C_in_pad)

    # explicit, generation-aware VMEM budget
    in_block = BB * C_in_pad * Lf_pad * 2                    # bf16
    out_block = BB * C_out_pad * HWp_pad * 2                 # bf16
    const_bytes = w_stk.size * 2 + (gamma_p.size + beta_p.size + valid.size) * 4
    scratch_bytes = 9 * C_in_pad * HWp_pad * 2               # stacked RHS
    temp_bytes = 6 * C_out_pad * HWp_pad * 4                 # f32 acc/d/y temporaries
    vmem_est = (2 * (in_block + out_block + const_bytes)
                + scratch_bytes + temp_bytes + (2 << 20))
    cap = (100 << 20) if vmem_cap >= (100 << 20) else (48 << 20)
    vmem_limit = int(min(max(vmem_est, 8 << 20), cap))

    return pl.pallas_call(
        kernel,
        out_shape=jax.ShapeDtypeStruct((B, C_out_pad, HWp_pad), jnp.bfloat16),
        grid=(n_steps,),
        in_specs=[
            pl.BlockSpec((BB, C_in_pad, Lf_pad), lambda b: (b, 0, 0)),        # flat input
            pl.BlockSpec((C_out_pad, 9 * C_in_pad), lambda b: (0, 0)),        # stacked W
            pl.BlockSpec((C_out_pad, 1), lambda b: (0, 0)),                   # gamma
            pl.BlockSpec((C_out_pad, 1), lambda b: (0, 0)),                   # beta
            pl.BlockSpec((1, HWp_pad), lambda b: (0, 0)),                     # valid mask
        ],
        out_specs=pl.BlockSpec((BB, C_out_pad, HWp_pad), lambda b: (b, 0, 0)),
        scratch_shapes=[pltpu.VMEM((9 * C_in_pad, HWp_pad), jnp.bfloat16)],
        compiler_params=pltpu.CompilerParams(
            dimension_semantics=("parallel",),      # batch steps are independent
            vmem_limit_bytes=vmem_limit,
        ),
    )(x_flat, w_stk, gamma_p, beta_p, valid)


# ---------------------------------------------------------------------------
# AttentionBlock.forward equivalent
# ---------------------------------------------------------------------------
def attention_block_forward(params, *inputs, resize=True):
    downsampling = len(inputs) == 1
    x = inputs[0] if downsampling else jnp.concatenate(inputs, axis=1)   # cat on channels

    conv_w = params["conv_w"]                # (C_out, C_in, 3, 3), OIHW
    gamma = params["gamma"]                  # (C_out,)
    beta = params["beta"]                    # (C_out,)

    B, C_in, H, W = x.shape
    C_out = conv_w.shape[0]
    assert conv_w.shape[1] == C_in

    C_in_pad = _round_up(C_in, 8)
    C_out_pad = _round_up(C_out, 8)
    Wp = W + 2                               # padded row width (zero border columns)
    HW = H * W
    HWp = H * Wp                             # output lanes incl. 2 dead columns per row
    HWp_pad = _round_up(HWp, 128)
    Lf_pad = _round_up(2 * Wp + 2 + HWp_pad, 128)

    # --- glue: zero-pad border, flatten (H+2)x(W+2) spatial to a lane axis, cast bf16 ---
    xb = x.astype(jnp.bfloat16)
    xp = jnp.pad(xb, ((0, 0), (0, 0), (1, 1), (1, 1)))            # (B, C_in, H+2, W+2)
    flat = xp.reshape(B, C_in, (H + 2) * Wp)
    x_flat = jnp.pad(flat, ((0, 0), (0, C_in_pad - C_in), (0, Lf_pad - (H + 2) * Wp)))
    # tap (kh, kw) of output lane q = i*Wp + j lives at lane q + kh*Wp + kw of this buffer.

    # stacked conv weights: (C_out_pad, 9*C_in_pad), column block t = 3*kh + kw
    wt = jnp.transpose(conv_w, (2, 3, 1, 0))                      # (3, 3, C_in, C_out)
    wt = jnp.pad(wt, ((0, 0), (0, 0), (0, C_in_pad - C_in), (0, C_out_pad - C_out)))
    w_stk = wt.reshape(9 * C_in_pad, C_out_pad).T.astype(jnp.bfloat16)

    gamma_p = jnp.pad(gamma.astype(jnp.float32), (0, C_out_pad - C_out),
                      constant_values=1.0).reshape(C_out_pad, 1)
    beta_p = jnp.pad(beta.astype(jnp.float32),
                     (0, C_out_pad - C_out)).reshape(C_out_pad, 1)

    lane = jnp.arange(HWp_pad)
    valid = ((lane < HWp) & ((lane % Wp) < W)).astype(jnp.float32).reshape(1, HWp_pad)

    # --- generation-aware batch folding (amortize ~0.35 us/step, big DMAs) ---
    vmem_cap, two_tc = _tpu_budgets()
    per_batch_bytes = C_in_pad * Lf_pad * 2 + C_out_pad * HWp_pad * 2
    step_budget = (10 << 20) if vmem_cap >= (100 << 20) else (5 << 20)
    divisors = [c for c in range(1, B + 1) if B % c == 0]
    feasible = [c for c in divisors if c * per_batch_bytes <= step_budget] or [1]
    if two_tc and B >= 2:
        even = [c for c in feasible if (B // c) % 2 == 0]     # balance the 2 TensorCores
        multi = [c for c in feasible if (B // c) >= 2]
        pool = even or multi or feasible
    else:
        pool = feasible                                       # single TC: fold everything
    BB = max(pool)

    # --- Pallas hot path ---
    y = _conv_norm_relu_pallas(x_flat, w_stk, gamma_p, beta_p, valid,
                               BB=BB, Wp=Wp, HW=HW, HWp_pad=HWp_pad, vmem_cap=vmem_cap)
    # strip padded channels / dead columns, back to f32 (fused with the reshape by XLA)
    skip = (y[:, :C_out, :HWp].reshape(B, C_out, H, Wp)[:, :, :, :W]).astype(jnp.float32)

    # --- nearest-neighbor resize (F.interpolate mode='nearest'), pure layout glue ---
    if resize:
        if downsampling:   # scale_factor = 0.5 -> out[i] = in[2i]
            out = skip[:, :, ::2, ::2][:, :, :H // 2, :W // 2]
        else:              # scale_factor = 2.0 -> out[i] = in[i // 2] (broadcast, no gather)
            out = jnp.broadcast_to(
                skip[:, :, :, None, :, None], (B, C_out, H, 2, W, 2)
            ).reshape(B, C_out, 2 * H, 2 * W)
    else:
        out = skip

    return (out, skip) if downsampling else out


# ---------------------------------------------------------------------------
# Pure-JAX reference for numerical check
# ---------------------------------------------------------------------------
def _reference_skip(x, conv_w, gamma, beta):
    y = jax.lax.conv_general_dilated(
        x, conv_w, window_strides=(1, 1), padding=((1, 1), (1, 1)),
        dimension_numbers=("NCHW", "OIHW", "NCHW"))
    mean = y.mean(axis=(2, 3), keepdims=True)
    var = ((y - mean) ** 2).mean(axis=(2, 3), keepdims=True)
    yn = (y - mean) / jnp.sqrt(var + EPS)
    yn = yn * gamma[None, :, None, None] + beta[None, :, None, None]
    return jnp.maximum(yn, 0.0)


if __name__ == "__main__":
    key = jax.random.PRNGKey(0)
    k_x, k_w, k_g, k_b, k_x2 = jax.random.split(key, 5)

    B, C_in, C_out, H, W = 2, 4, 8, 16, 16

    x = jax.random.normal(k_x, (B, C_in, H, W), dtype=jnp.float32)
    params = {
        "conv_w": jax.random.normal(k_w, (C_out, C_in, 3, 3), dtype=jnp.float32) * 0.1,
        "gamma": 1.0 + 0.1 * jax.random.normal(k_g, (C_out,), dtype=jnp.float32),
        "beta": 0.1 * jax.random.normal(k_b, (C_out,), dtype=jnp.float32),
    }

    # Downsampling path: single input -> (downsampled, skip)
    down, skip = attention_block_forward(params, x, resize=True)
    jax.block_until_ready((down, skip))
    assert skip.shape == (B, C_out, H, W)
    assert down.shape == (B, C_out, H // 2, W // 2)

    # Upsampling path: two inputs concatenated on channels -> single upsampled output
    xa = x[:, :2]
    xb = jax.random.normal(k_x2, (B, 2, H, W), dtype=jnp.float32)
    up = attention_block_forward(params, xa, xb, resize=True)
    jax.block_until_ready(up)
    assert up.shape == (B, C_out, 2 * H, 2 * W)

    # Numerical check of the Pallas hot path vs pure-JAX f32 reference (bf16 MXU stream)
    ref = _reference_skip(x, params["conv_w"], params["gamma"], params["beta"])
    max_err = float(jnp.max(jnp.abs(skip - ref)))
    assert jnp.allclose(skip, ref, atol=3e-2, rtol=3e-2), max_err
    assert jnp.allclose(down, ref[:, :, ::2, ::2], atol=3e-2, rtol=3e-2)

    print("KERNEL_OK")
</pallas_src>

<mosaic_0001>
module attributes {stable_mosaic.version = 11 : i64} {
  func.func @_attn_block_kernel(%arg0: i32, %arg1: memref<1x8x512xbf16, #tpu.memory_space<vmem>>, %arg2: memref<8x72xbf16, #tpu.memory_space<vmem>>, %arg3: memref<8x1xf32, #tpu.memory_space<vmem>>, %arg4: memref<8x1xf32, #tpu.memory_space<vmem>>, %arg5: memref<1x384xf32, #tpu.memory_space<vmem>>, %arg6: memref<1x8x384xbf16, #tpu.memory_space<vmem>>, %arg7: memref<72x384xbf16, #tpu.memory_space<vmem>>) attributes {dimension_semantics = [#tpu.dimension_semantics<parallel>], iteration_bounds = array<i64: 2>, scalar_prefetch = 0 : i64, scratch_operands = 1 : i64, tpu.core_type = #tpu.core_type<tc>, window_params = [{transform_indices = @transform_0, window_bounds = array<i64: 1, 8, 512>}, {pipeline_mode = #tpu.pipeline_mode<synchronous>, transform_indices = @transform_1, window_bounds = array<i64: 8, 72>}, {pipeline_mode = #tpu.pipeline_mode<synchronous>, transform_indices = @transform_2, window_bounds = array<i64: 8, 1>}, {pipeline_mode = #tpu.pipeline_mode<synchronous>, transform_indices = @transform_3, window_bounds = array<i64: 8, 1>}, {pipeline_mode = #tpu.pipeline_mode<synchronous>, transform_indices = @transform_4, window_bounds = array<i64: 1, 384>}, {transform_indices = @transform_5, window_bounds = array<i64: 1, 8, 384>}]} {
    %c0 = arith.constant 0 : index
    %c0_0 = arith.constant 0 : index
    %0 = vector.load %arg2[%c0, %c0_0] : memref<8x72xbf16, #tpu.memory_space<vmem>>, vector<8x72xbf16>
    %c0_1 = arith.constant 0 : index
    %c0_2 = arith.constant 0 : index
    %1 = vector.load %arg3[%c0_1, %c0_2] : memref<8x1xf32, #tpu.memory_space<vmem>>, vector<8x1xf32>
    %c0_3 = arith.constant 0 : index
    %c0_4 = arith.constant 0 : index
    %2 = vector.load %arg4[%c0_3, %c0_4] : memref<8x1xf32, #tpu.memory_space<vmem>>, vector<8x1xf32>
    %c0_5 = arith.constant 0 : index
    %c0_6 = arith.constant 0 : index
    %3 = vector.load %arg5[%c0_5, %c0_6] : memref<1x384xf32, #tpu.memory_space<vmem>>, vector<1x384xf32>
    %c0_7 = arith.constant 0 : index
    %c0_8 = arith.constant 0 : index
    %c0_9 = arith.constant 0 : index
    %4 = vector.load %arg1[%c0_7, %c0_8, %c0_9] : memref<1x8x512xbf16, #tpu.memory_space<vmem>>, vector<1x8x512xbf16>
    %5 = vector.shape_cast %4 : vector<1x8x512xbf16> to vector<8x512xbf16>
    %6 = vector.extract_strided_slice %5 {offsets = [0, 0], sizes = [8, 384], strides = [1, 1]} : vector<8x512xbf16> to vector<8x384xbf16>
    %c0_10 = arith.constant 0 : index
    %c0_11 = arith.constant 0 : index
    %7 = vector.load %arg7[%c0_10, %c0_11] : memref<72x384xbf16, #tpu.memory_space<vmem>>, vector<8x384xbf16>
    tpu.vector_store %arg7[%c0_10, %c0_11], %6 {strides = array<i32>} : memref<72x384xbf16, #tpu.memory_space<vmem>>, vector<8x384xbf16>,
    %8 = vector.extract_strided_slice %5 {offsets = [0, 1], sizes = [8, 384], strides = [1, 1]} : vector<8x512xbf16> to vector<8x384xbf16>
    %c8 = arith.constant 8 : index
    %c0_12 = arith.constant 0 : index
    %9 = vector.load %arg7[%c8, %c0_12] : memref<72x384xbf16, #tpu.memory_space<vmem>>, vector<8x384xbf16>
    tpu.vector_store %arg7[%c8, %c0_12], %8 {strides = array<i32>} : memref<72x384xbf16, #tpu.memory_space<vmem>>, vector<8x384xbf16>,
    %10 = vector.extract_strided_slice %5 {offsets = [0, 2], sizes = [8, 384], strides = [1, 1]} : vector<8x512xbf16> to vector<8x384xbf16>
    %c16 = arith.constant 16 : index
    %c0_13 = arith.constant 0 : index
    %11 = vector.load %arg7[%c16, %c0_13] : memref<72x384xbf16, #tpu.memory_space<vmem>>, vector<8x384xbf16>
    tpu.vector_store %arg7[%c16, %c0_13], %10 {strides = array<i32>} : memref<72x384xbf16, #tpu.memory_space<vmem>>, vector<8x384xbf16>,
    %12 = vector.extract_strided_slice %5 {offsets = [0, 18], sizes = [8, 384], strides = [1, 1]} : vector<8x512xbf16> to vector<8x384xbf16>
    %c24 = arith.constant 24 : index
    %c0_14 = arith.constant 0 : index
    %13 = vector.load %arg7[%c24, %c0_14] : memref<72x384xbf16, #tpu.memory_space<vmem>>, vector<8x384xbf16>
    tpu.vector_store %arg7[%c24, %c0_14], %12 {strides = array<i32>} : memref<72x384xbf16, #tpu.memory_space<vmem>>, vector<8x384xbf16>,
    %14 = vector.extract_strided_slice %5 {offsets = [0, 19], sizes = [8, 384], strides = [1, 1]} : vector<8x512xbf16> to vector<8x384xbf16>
    %c32 = arith.constant 32 : index
    %c0_15 = arith.constant 0 : index
    %15 = vector.load %arg7[%c32, %c0_15] : memref<72x384xbf16, #tpu.memory_space<vmem>>, vector<8x384xbf16>
    tpu.vector_store %arg7[%c32, %c0_15], %14 {strides = array<i32>} : memref<72x384xbf16, #tpu.memory_space<vmem>>, vector<8x384xbf16>,
    %16 = vector.extract_strided_slice %5 {offsets = [0, 20], sizes = [8, 384], strides = [1, 1]} : vector<8x512xbf16> to vector<8x384xbf16>
    %c40 = arith.constant 40 : index
    %c0_16 = arith.constant 0 : index
    %17 = vector.load %arg7[%c40, %c0_16] : memref<72x384xbf16, #tpu.memory_space<vmem>>, vector<8x384xbf16>
    tpu.vector_store %arg7[%c40, %c0_16], %16 {strides = array<i32>} : memref<72x384xbf16, #tpu.memory_space<vmem>>, vector<8x384xbf16>,
    %18 = vector.extract_strided_slice %5 {offsets = [0, 36], sizes = [8, 384], strides = [1, 1]} : vector<8x512xbf16> to vector<8x384xbf16>
    %c48 = arith.constant 48 : index
    %c0_17 = arith.constant 0 : index
    %19 = vector.load %arg7[%c48, %c0_17] : memref<72x384xbf16, #tpu.memory_space<vmem>>, vector<8x384xbf16>
    tpu.vector_store %arg7[%c48, %c0_17], %18 {strides = array<i32>} : memref<72x384xbf16, #tpu.memory_space<vmem>>, vector<8x384xbf16>,
    %20 = vector.extract_strided_slice %5 {offsets = [0, 37], sizes = [8, 384], strides = [1, 1]} : vector<8x512xbf16> to vector<8x384xbf16>
    %c56 = arith.constant 56 : index
    %c0_18 = arith.constant 0 : index
    %21 = vector.load %arg7[%c56, %c0_18] : memref<72x384xbf16, #tpu.memory_space<vmem>>, vector<8x384xbf16>
    tpu.vector_store %arg7[%c56, %c0_18], %20 {strides = array<i32>} : memref<72x384xbf16, #tpu.memory_space<vmem>>, vector<8x384xbf16>,
    %22 = vector.extract_strided_slice %5 {offsets = [0, 38], sizes = [8, 384], strides = [1, 1]} : vector<8x512xbf16> to vector<8x384xbf16>
    %c64 = arith.constant 64 : index
    %c0_19 = arith.constant 0 : index
    %23 = vector.load %arg7[%c64, %c0_19] : memref<72x384xbf16, #tpu.memory_space<vmem>>, vector<8x384xbf16>
    tpu.vector_store %arg7[%c64, %c0_19], %22 {strides = array<i32>} : memref<72x384xbf16, #tpu.memory_space<vmem>>, vector<8x384xbf16>,
    %c0_20 = arith.constant 0 : index
    %c0_21 = arith.constant 0 : index
    %24 = vector.load %arg7[%c0_20, %c0_21] : memref<72x384xbf16, #tpu.memory_space<vmem>>, vector<72x384xbf16>
    %cst = arith.constant dense<0.000000e+00> : vector<8x384xf32>
    %25 = tpu.matmul %0, %24, %cst {dimension_numbers = #tpu.dot_dimension_numbers<[1], [0], [0], [1], [0, 0, 1, 1], [], []>} : vector<8x72xbf16>, vector<72x384xbf16>, vector<8x384xf32> -> vector<8x384xf32>
    %26 = vector.broadcast %3 : vector<1x384xf32> to vector<8x384xf32>
    %27 = arith.mulf %25, %26 : vector<8x384xf32>
    %cst_22 = arith.constant dense<0.000000e+00> : vector<8xf32>
    %28 = vector.multi_reduction <add>, %27, %cst_22 [1] : vector<8x384xf32> to vector<8xf32>
    %29 = vector.shape_cast %28 : vector<8xf32> to vector<8x1xf32>
    %cst_23 = arith.constant 3.906250e-03 : f32
    %30 = vector.broadcast %cst_23 : f32 to vector<8x1xf32>
    %31 = arith.mulf %29, %30 : vector<8x1xf32>
    %32 = vector.broadcast %31 : vector<8x1xf32> to vector<8x384xf32>
    %33 = arith.subf %27, %32 : vector<8x384xf32>
    %34 = vector.broadcast %3 : vector<1x384xf32> to vector<8x384xf32>
    %35 = arith.mulf %33, %34 : vector<8x384xf32>
    %36 = arith.mulf %35, %35 : vector<8x384xf32>
    %cst_24 = arith.constant dense<0.000000e+00> : vector<8xf32>
    %37 = vector.multi_reduction <add>, %36, %cst_24 [1] : vector<8x384xf32> to vector<8xf32>
    %38 = vector.shape_cast %37 : vector<8xf32> to vector<8x1xf32>
    %cst_25 = arith.constant 3.906250e-03 : f32
    %39 = vector.broadcast %cst_25 : f32 to vector<8x1xf32>
    %40 = arith.mulf %38, %39 : vector<8x1xf32>
    %cst_26 = arith.constant 9.99999974E-6 : f32
    %41 = vector.broadcast %cst_26 : f32 to vector<8x1xf32>
    %42 = arith.addf %40, %41 : vector<8x1xf32>
    %43 = math.rsqrt %42 : vector<8x1xf32>
    %44 = arith.mulf %43, %1 : vector<8x1xf32>
    %45 = vector.broadcast %44 : vector<8x1xf32> to vector<8x384xf32>
    %46 = arith.mulf %35, %45 : vector<8x384xf32>
    %47 = vector.broadcast %2 : vector<8x1xf32> to vector<8x384xf32>
    %48 = arith.addf %46, %47 : vector<8x384xf32>
    %cst_27 = arith.constant 0.000000e+00 : f32
    %49 = vector.broadcast %cst_27 : f32 to vector<8x384xf32>
    %50 = arith.maximumf %48, %49 : vector<8x384xf32>
    %51 = arith.truncf %50 : vector<8x384xf32> to vector<8x384xbf16>
    %c0_28 = arith.constant 0 : index
    %c0_29 = arith.constant 0 : index
    %c0_30 = arith.constant 0 : index
    %52 = vector.load %arg6[%c0_28, %c0_29, %c0_30] : memref<1x8x384xbf16, #tpu.memory_space<vmem>>, vector<1x8x384xbf16>
    %53 = vector.shape_cast %52 : vector<1x8x384xbf16> to vector<8x384xbf16>
    %54 = vector.shape_cast %51 : vector<8x384xbf16> to vector<1x8x384xbf16>
    tpu.vector_store %arg6[%c0_28, %c0_29, %c0_30], %54 {strides = array<i32>} : memref<1x8x384xbf16, #tpu.memory_space<vmem>>, vector<1x8x384xbf16>,
    return
  }
  func.func @transform_0(%arg0: i32) -> (i32, i32, i32) {
    %c0_i32 = arith.constant 0 : i32
    %c0_i32_0 = arith.constant 0 : i32
    %c0_i32_1 = arith.constant 0 : i32
    return %arg0, %c0_i32, %c0_i32_0 : i32, i32, i32
  }
  func.func @transform_1(%arg0: i32) -> (i32, i32) {
    %c0_i32 = arith.constant 0 : i32
    %c0_i32_0 = arith.constant 0 : i32
    %c0_i32_1 = arith.constant 0 : i32
    return %c0_i32, %c0_i32_0 : i32, i32
  }
  func.func @transform_2(%arg0: i32) -> (i32, i32) {
    %c0_i32 = arith.constant 0 : i32
    %c0_i32_0 = arith.constant 0 : i32
    %c0_i32_1 = arith.constant 0 : i32
    return %c0_i32, %c0_i32_0 : i32, i32
  }
  func.func @transform_3(%arg0: i32) -> (i32, i32) {
    %c0_i32 = arith.constant 0 : i32
    %c0_i32_0 = arith.constant 0 : i32
    %c0_i32_1 = arith.constant 0 : i32
    return %c0_i32, %c0_i32_0 : i32, i32
  }
  func.func @transform_4(%arg0: i32) -> (i32, i32) {
    %c0_i32 = arith.constant 0 : i32
    %c0_i32_0 = arith.constant 0 : i32
    %c0_i32_1 = arith.constant 0 : i32
    return %c0_i32, %c0_i32_0 : i32, i32
  }
  func.func @transform_5(%arg0: i32) -> (i32, i32, i32) {
    %c0_i32 = arith.constant 0 : i32
    %c0_i32_0 = arith.constant 0 : i32
    %c0_i32_1 = arith.constant 0 : i32
    return %arg0, %c0_i32, %c0_i32_0 : i32, i32, i32
  }
}

</mosaic_0001>

<bundles_post_ra>
// kernel: tpu_custom_call.1
= control target key start
LH: loop header
LB: loop body
LE: loop exit
PB: predicated region body
PF: predicated region fallthrough
CT: control target
= control target key end

     0   :  { %10 = vsyncpa [#allocation4], 0  ;;  %s1176_s0 = inlined_call_operand.hbm [shape: bf16[2,8,512], index: 0, kind: input, shape index: {}]   ;;  %s1177_s1 = inlined_call_operand.vmem [shape: bf16[8,72], index: 1, kind: input, shape index: {}]   ;;  %s1178_s2 = inlined_call_operand.vmem [shape: f32[8,1], index: 2, kind: input, shape index: {}]   ;;  %s1179_s3 = inlined_call_operand.vmem [shape: f32[8,1], index: 3, kind: input, shape index: {}]   ;;  %s1180_s4 = inlined_call_operand.vmem [shape: f32[1,384], index: 4, kind: input, shape index: {}]   ;;  %s1181_s5 = inlined_call_operand.hbm [shape: bf16[2,8,384], index: 5, kind: output, shape index: {}]  }
   0x1   :  { %12 = vsyncpa [#allocation4 + $0x1], 0 }
   0x2   :  { %13 = vsyncpa [#allocation5], 0 }
   0x3   :  { %15 = vsyncpa [#allocation5 + $0x1], 0  ;;  %s973_s18 = smov 0   ;;  %s975_s19 = smov 0  }
   0x4   :  { %s977_s20 = smov 0   ;;  %s979_s21 = smov 0  }
   0x5 LB: > { %s994_s22 = sadd.s32 4294967295, %s928_s21   ;;  %s710_s23 = sadd.s32 4294967294, %s928_s21   ;;  %s928_s21 = sphi %s979_s21, %s1196_s21   ;;  %s924_s20 = sphi %s977_s20, %s1195_s20   ;;  %s920_s19 = sphi %s975_s19, %s1194_s19   ;;  %s916_s18 = sphi %s973_s18, %s1193_s18  }
   0x6   : > { %s998_s24 = sadd.s32 1, %s928_s21   ;;  %s28_s25 = sadd.s32 1, %s924_s20 }
   0x7   : > { %s25_s26 = ssub.s32 %s928_s21, %s998_s24  ;;  %p35_p0 = scmp.ne.s32.totalorder %s924_s20, %s920_s19 }
   0x8   : > { %p26_p1 = scmp.eq.s32.totalorder %s25_s26, 0  ;;  %p36_p2 = scmp.eq.s32.totalorder %s928_s21, 0 }
   0x9   : > { %p41_p3 = scmp.ne.s32.totalorder %s920_s19, %s916_s18  ;;  %p42_p4 = scmp.eq.s32.totalorder %s994_s22, 0 }
   0xa   : > { %s1010_s27 = scalar_select %p26_p1, %s924_s20, %s28_s25  }
   0xb   : > { %p1012_p5 = por %p36_p2, %p35_p0  ;;  %p1016_p6 = por %p42_p4, %p41_p3 }
   0xc   : > { %p149_p7 = scmp.eq.s32.totalorder %s994_s22, 1  ;;  %p155_p8 = scmp.eq.s32.totalorder %s710_s23, 1 }
   0xd   : > { %p778_p10 = scmp.lt.s32.totalorder %s928_s21, 2  ;;  %s187_s7 = sand.u32 1, %s924_s20  }
   0xe   : > { %p1023_p11 = por %p149_p7, %p35_p0  ;;  %p1027_p12 = por %p155_p8, %p41_p3 }
   0xf   : > { %s741_s8 = sshll.u32 %s928_s21, 8  ;;  %s713_s9 = sshll.u32 %s187_s7, 4 }
  0x10   : > { %s1185_s30 = scalar_select %p1023_p11, 1, 0 }
  0x11   : > { %s1186_s6 = scalar_select %p1027_p12, 1, 0 }
  0x12   : > { %s1036_s12 = scalar_lea.hbm %s1176_s0, %s741_s8  ;;  %s191_s13 = scalar_lea.vmem [#allocation3], %s713_s9 }
  0x13   : > { %s199_s14 = sshll.u32 %s191_s13, 4  ;;  %p1040_p13 = pnand %p778_p10, %p1012_p5  ;;  %s1044_s14 = int_to_ptr.vmem [resolvable:$true] %s199_s14 }
  0x14   : > { %s188_s16 = scalar_lea.sflag [#allocation4], %s187_s7  ;;  %s832_s17 = scalar_lea.hbm %s1036_s12, 256 }
  0x15   : > { %p833_p2 = scmp.ne.s32.totalorder %s1036_s12, %s832_s17  ;;  %p834_p3 = pneg %p1040_p13 }
  0x16   : > { %s837_s26 = scalar_lea.hbm %s1176_s0, 512  ;;  %p838_p5 = scmp.lt.u32.totalorder %s1036_s12, %s1176_s0 }
  0x17   : > { %p835_p4 = pnand %p834_p3, %p833_p2  ;;  %p839_p8 = scmp.lt.u32.totalorder %s837_s26, %s832_s17 }
  0x18   : > { %p841_p9 = scmp.lt.u32.totalorder %s832_s17, %s1036_s12 }
  0x19   : > { %p836_p7 = pneg %p835_p4  ;;  %p840_p10 = por %p839_p8, %p838_p5 }
  0x1b   : > { %p842_p0 = por %p841_p9, %p840_p10 }
  0x1d   : > { %p843_p1 = pnand %p842_p0, %p836_p7 }
  0x1f   : > { %846 = shalt.err (!%p843_p1)
}
  0x20   : > { %s847_s7 = scalar_lea.vmem %s1044_s14, 256  ;;  %s930_s9 = smov [#allocation3]  }
  0x21   : > { %p848_p2 = scmp.ne.s32.totalorder %s1044_s14, %s847_s7  ;;  %s852_s10 = sshll.u32 %s930_s9, 4  ;;  %s853_s10 = int_to_ptr.vmem [resolvable:$false] %s852_s10 }
  0x22   : > { %s854_s11 = scalar_lea.vmem %s853_s10, 512  ;;  %p855_p11 = scmp.lt.s32.totalorder %s1044_s14, %s853_s10 }
  0x23   : > { %p850_p4 = pnand %p848_p2, %p834_p3  ;;  %p856_p5 = scmp.lt.s32.totalorder %s854_s11, %s847_s7 }
  0x25   : > { %p851_p12 = pneg %p850_p4  ;;  %p857_p8 = por %p856_p5, %p855_p11 }
  0x27   : > { %p858_p9 = pnand %p857_p8, %p851_p12 }
  0x29   : > { %861 = shalt.err (!%p858_p9)
}
  0x2a   : > { %773 = dma.hbm_to_vmem [thread:$0]  (!%p1040_p13), %s1036_s12, 256, %s1044_s14, %s188_s16  }
  0x2b   : > { %p1188_p0 = scmp.lt.s32.totalorder %s928_s21, 3  ;;  %p1189_p1 = scmp.ge.s32.totalorder %s928_s21, 1 }
  0x2d   : > { %p205_p3 = pnand %p1189_p1, %p1188_p0 }
  0x2e   : > { %s1078_s13 = sand.u32 (!%p205_p3), 1, %s920_s19  }
  0x2f   : > { %208 = sbr.rel (%p205_p3) target bundleno = 893 (0x37d), region = 40  ;;  %s717_s17 = sshll.u32 (!%p205_p3), %s1078_s13, 4 }
  0x30   : > { %s211_s23 = scalar_lea.sflag (!%p205_p3), [#allocation4], %s1078_s13  ;;  %s214_s25 = scalar_lea.vmem (!%p205_p3), [#allocation3], %s717_s17 }
  0x36   : > { %907 = dma.done.wait (%p1016_p6), %s211_s23, 256  }
  0x37   : > { %909 = vsyncadd (%p1016_p6), %s211_s23, 4294967040  ;;  %v1086_v0 = vld [vmem:[%s214_s25] sm:$0xff]  ;;  %v247_v1 = vld [vmem:[%s214_s25 + $0x8] sm:$0xff]  ;;  %s931_s12 = smov 126   ;;  %s932_s14 = smov 127   ;;  %v933_v2 = vmov 0.0  }
  0x38   : > { %267 = vrot.lane.b32.xlu1 %v1086_v0, %s931_s12  ;;  %252 = vrot.lane.b32.xlu0 %v1086_v0, %s932_s14  ;;  %249 = vst [vmem:[#allocation2 + $0x8] sm:$0xf] %v247_v1  ;;  %s934_s15 = smov 110   ;;  %s935_s29 = smov 109   ;;  %v939_v3 = vmov 0   ;;  %vm941_vm0 = vmmov 0  }
  0x39   : > { %750 = vmatprep.subr.bf16.mxu1 %v933_v2  ;;  %s936_s16 = smov 108   ;;  %s937_s26 = smov 92   ;;  %501 = vmatprep.mubr.bf16.mxu0 %v939_v3  ;;  %vm258_vm1 = vcmask 1043456   ;;  %vm274_vm2 = vcmask 1031168   ;;  %vm260_vm3 = vcmask 1039360   ;;  %vm288_vm4 = vcmask 900096  }
  0x3a   : > { %s938_s28 = smov 91   ;;  %823 = vset.pattern.permute.xlu0 %v939_v3  ;;  %824 = vset.pattern.permute.xlu1 %v939_v3  ;;  %s940_s8 = smov 90   ;;  %vm302_vm5 = vcmask 891904   ;;  %vm316_vm6 = vcmask 883712   ;;  %vm330_vm7 = vcmask 752640   ;;  %vm344_vm8 = vcmask 744448  }
  0x3b   : > { %760 = vmatprep.mubr.msk.bf16.mxu1 %vm941_vm0, %v933_v2  ;;  %vm358_vm9 = vcmask 736256   ;;  %vm455_vm10 = vcmask 588800   ;;  %p1190_p11 = scmp.ne.s32.totalorder %s1185_s30, 0  ;;  %s942_s9 = smov [#allocation6]  }
  0x3c   : > { %269 = vrot.lane.b32.xlu1 %v247_v1, %s931_s12  ;;  %254 = vrot.lane.b32.xlu0 %v247_v1, %s932_s14  ;;  %s764_s14 = smul.u32 12, %s1078_s13  ;;  %s866_s10 = sshll.u32 %s942_s9, 4  ;;  %s867_s10 = int_to_ptr.vmem [resolvable:$false] %s866_s10 }
  0x3d   : > { %s868_s11 = scalar_lea.vmem %s867_s10, 384 }
  0x40   : > { %283 = vrot.lane.b32.xlu1 %v247_v1, %s934_s15  ;;  %281 = vrot.lane.b32.xlu0 %v1086_v0, %s934_s15  ;;  %s765_s15 = smul.u32 192, %s994_s22  ;;  %s626_s22 = scalar_lea.sflag [#allocation5], %s1078_s13 }
  0x44   : > { %297 = vrot.lane.b32.xlu1 %v247_v1, %s935_s29  ;;  %295 = vrot.lane.b32.xlu0 %v1086_v0, %s935_s29  ;;  %s240_s29 = scalar_lea.vmem [#allocation6], %s764_s14 }
  0x48   : > { %311 = vrot.lane.b32.xlu1 %v247_v1, %s936_s16  ;;  %309 = vrot.lane.b32.xlu0 %v1086_v0, %s936_s16  ;;  %s640_s16 = sshll.u32 %s240_s29, 4  ;;  %s1134_s16 = int_to_ptr.vmem [resolvable:$true] %s640_s16 }
  0x49   : > { %s862_s7 = scalar_lea.vmem %s1134_s16, 192  ;;  %p869_p7 = scmp.lt.s32.totalorder %s1134_s16, %s867_s10 }
  0x4a   : > { %p863_p6 = scmp.ne.s32.totalorder %s1134_s16, %s862_s7  ;;  %p870_p10 = scmp.lt.s32.totalorder %s868_s11, %s862_s7 }
  0x4c   : > { %325 = vrot.lane.b32.xlu1 %v247_v1, %s937_s26  ;;  %323 = vrot.lane.b32.xlu0 %v1086_v0, %s937_s26  ;;  %p864_p12 = pnand %p863_p6, %p1190_p11  ;;  %p871_p2 = por %p870_p10, %p869_p7 }
  0x4e   : > { %p865_p13 = pneg %p864_p12 }
  0x50   : > { %339 = vrot.lane.b32.xlu1 %v247_v1, %s938_s28  ;;  %337 = vrot.lane.b32.xlu0 %v1086_v0, %s938_s28  ;;  %p872_p4 = pnand %p871_p2, %p865_p13 }
  0x54   : > { %353 = vrot.lane.b32.xlu1 %v247_v1, %s940_s8  ;;  %351 = vrot.lane.b32.xlu0 %v1086_v0, %s940_s8  ;;  %s1132_s8 = scalar_lea.hbm %s1181_s5, %s765_s15 }
  0xaa   : > { %v268_v4 = vpop.permute.xlu1 %267  ;;  %v253_v5 = vpop.permute.xlu0 %252 }
  0xab   : > { %v256_v6 = vrot.slane %v253_v5, 4  ;;  %v271_v9 = vrot.slane %v268_v4, 4 }
  0xae   : > { %v270_v7 = vpop.permute.xlu1 %269  ;;  %v255_v8 = vpop.permute.xlu0 %254 }
  0xaf   : > { %v272_v10 = vrot.slane %v270_v7, 4  ;;  %v257_v11 = vrot.slane %v255_v8, 4 }
  0xb1   : > { %v273_v12 = vsel %vm258_vm1, %v271_v9, %v272_v10  ;;  %v276_v13 = vsel %vm274_vm2, %v270_v7, %v272_v10  ;;  %v259_v14 = vsel %vm258_vm1, %v256_v6, %v257_v11  ;;  %v262_v15 = vsel %vm260_vm3, %v255_v8, %v257_v11 }
  0xb2   : > { %v275_v16 = vsel %vm274_vm2, %v268_v4, %v273_v12  ;;  %280 = vst [vmem:[#allocation2 + $0x20] sm:$0xf] %v276_v13  ;;  %v261_v17 = vsel %vm260_vm3, %v253_v5, %v259_v14  ;;  %266 = vst [vmem:[#allocation2 + $0x14] sm:$0xf] %v262_v15  ;;  %v284_v18 = vpop.permute.xlu1 %283  ;;  %v282_v19 = vpop.permute.xlu0 %281  ;;  %v242_v12 = vld [vmem:[%s1177_s1] sm:$0xf]  ;;  %v551_v15 = vlaneseq }
  0xb3   : > { %v286_v20 = vrot.slane %v284_v18, 4  ;;  %v285_v21 = vrot.slane %v282_v19, 4  ;;  %v719_v22 = vcombine.high %v1086_v0, %v261_v17  ;;  %v718_v23 = vcombine.low %v1086_v0, %v261_v17 }
  0xb5   : > { %v290_v24 = vsel %vm288_vm4, %v284_v18, %v286_v20  ;;  %v287_v25 = vsel %vm258_vm1, %v285_v21, %v286_v20  ;;  %469 = vmatprep.subr.bf16.mxu0 %v719_v22  ;;  %v245_v18 = vld [vmem:[%s1180_s4] sm:$0x7] }
  0xb6   : > { %294 = vst [vmem:[#allocation2 + $0x2c] sm:$0xf] %v290_v24  ;;  %v289_v26 = vsel %vm288_vm4, %v282_v19, %v287_v25  ;;  %v298_v27 = vpop.permute.xlu1 %297  ;;  %v296_v28 = vpop.permute.xlu0 %295  ;;  %470 = vmatpush1.bf16.msra.mxu0 %v718_v23 }
  0xb7   : > { %v300_v29 = vrot.slane %v298_v27, 4  ;;  %v299_v30 = vrot.slane %v296_v28, 4  ;;  %v722_v31 = vcombine.high %v275_v16, %v289_v26  ;;  %v721_v32 = vcombine.low %v275_v16, %v289_v26 }
  0xb8   : > { %v552_v16 = vshrl.u32 %v551_v15, 7 }
  0xb9   : > { %v304_v33 = vsel %vm302_vm5, %v298_v27, %v300_v29  ;;  %v301_v34 = vsel %vm258_vm1, %v299_v30, %v300_v29  ;;  %v825_v35 = vld [vmem:[#allocation2 + $0x8] ss:$12 sps:$4 sm:$0xff]   ;;  %471 = vmatprep.subr.bf16.mxu0 %v722_v31 }
  0xba   : > { %308 = vst [vmem:[#allocation2 + $0x38] sm:$0xf] %v304_v33  ;;  %v303_v36 = vsel %vm302_vm5, %v296_v28, %v301_v34  ;;  %v312_v37 = vpop.permute.xlu1 %311  ;;  %v310_v38 = vpop.permute.xlu0 %309  ;;  %472 = vmatpush1.bf16.msra.mxu0 %v721_v32  ;;  %751 = vmatpush3.bf16.msra.mxu1 %v825_v35  ;;  %v553_v17 = vsub.s32 0, %v552_v16  ;;  %v557_v19 = vsub.s32 1, %v552_v16  ;;  %v561_v22 = vsub.s32 2, %v552_v16 }
  0xbb   : > { %v314_v39 = vrot.slane %v312_v37, 4  ;;  %v313_v40 = vrot.slane %v310_v38, 4  ;;  %752 = vmatprep.subr.bf16.mxu1 %v933_v2 }
  0xbc   : > { %v554_v20 = vrot.slane %v245_v18, %v553_v17  ;;  %v558_v21 = vrot.slane %v245_v18, %v557_v19  ;;  %v562_v27 = vrot.slane %v245_v18, %v561_v22 }
  0xbd   : > { %v318_v41 = vsel %vm316_vm6, %v312_v37, %v314_v39  ;;  %v315_v42 = vsel %vm258_vm1, %v313_v40, %v314_v39  ;;  %v826_v43 = vld [vmem:[#allocation2 + $0x20] ss:$12 sps:$4 sm:$0xff]  }
  0xbe   : > { %322 = vst [vmem:[#allocation2 + $0x44] sm:$0xf] %v318_v41  ;;  %v317_v44 = vsel %vm316_vm6, %v310_v38, %v315_v42  ;;  %v326_v45 = vpop.permute.xlu1 %325  ;;  %v324_v46 = vpop.permute.xlu0 %323  ;;  %753 = vmatpush3.bf16.msra.mxu1 %v826_v43 }
  0xbf   : > { %v328_v47 = vrot.slane %v326_v45, 4  ;;  %v327_v48 = vrot.slane %v324_v46, 4  ;;  %v725_v49 = vcombine.high %v303_v36, %v317_v44  ;;  %v724_v50 = vcombine.low %v303_v36, %v317_v44  ;;  %754 = vmatprep.subr.bf16.mxu1 %v933_v2 }
  0xc1   : > { %v332_v51 = vsel %vm330_vm7, %v326_v45, %v328_v47  ;;  %v329_v52 = vsel %vm258_vm1, %v327_v48, %v328_v47  ;;  %473 = vmatprep.subr.bf16.mxu0 %v725_v49  ;;  %v244_v49 = vld [vmem:[%s1179_s3] sm:$0xff] }
  0xc2   : > { %336 = vst [vmem:[#allocation2 + $0x50] sm:$0xf] %v332_v51  ;;  %v331_v53 = vsel %vm330_vm7, %v324_v46, %v329_v52  ;;  %v340_v54 = vpop.permute.xlu1 %339  ;;  %v338_v55 = vpop.permute.xlu0 %337  ;;  %474 = vmatpush1.bf16.msra.mxu0 %v724_v50 }
  0xc3   : > { %v342_v56 = vrot.slane %v340_v54, 4  ;;  %v341_v57 = vrot.slane %v338_v55, 4 }
  0xc5   : > { %v346_v58 = vsel %vm344_vm8, %v340_v54, %v342_v56  ;;  %v343_v59 = vsel %vm258_vm1, %v341_v57, %v342_v56  ;;  %v827_v60 = vld [vmem:[#allocation2 + $0x38] ss:$12 sps:$4 sm:$0xff]  }
  0xc6   : > { %350 = vst [vmem:[#allocation2 + $0x5c] sm:$0xf] %v346_v58  ;;  %v345_v61 = vsel %vm344_vm8, %v338_v55, %v343_v59  ;;  %v354_v62 = vpop.permute.xlu1 %353  ;;  %v352_v63 = vpop.permute.xlu0 %351  ;;  %755 = vmatpush3.bf16.msra.mxu1 %v827_v60 }
  0xc7   : > { %v356_v0 = vrot.slane %v354_v62, 4  ;;  %v355_v1 = vrot.slane %v352_v63, 4  ;;  %v728_v3 = vcombine.high %v331_v53, %v345_v61  ;;  %v727_v4 = vcombine.low %v331_v53, %v345_v61  ;;  %756 = vmatprep.subr.bf16.mxu1 %v933_v2  ;;  %v243_v53 = vld [vmem:[%s1178_s2] sm:$0xff] }
  0xc9   : > { %v360_v5 = vsel %vm358_vm9, %v354_v62, %v356_v0  ;;  %v357_v6 = vsel %vm258_vm1, %v355_v1, %v356_v0  ;;  %475 = vmatprep.subr.bf16.mxu0 %v728_v3 }
  0xca   : > { %364 = vst [vmem:[#allocation2 + $0x68] sm:$0xf] %v360_v5  ;;  %v359_v7 = vsel %vm358_vm9, %v352_v63, %v357_v6  ;;  %476 = vmatpush1.bf16.msra.mxu0 %v727_v4 }
  0xcb   : > { %v731_v8 = vcombine.high %v359_v7, %v359_v7  ;;  %v730_v9 = vcombine.low %v359_v7, %v359_v7 }
  0xcd   : > { %v828_v10 = vld [vmem:[#allocation2 + $0x50] ss:$12 sps:$4 sm:$0xff]   ;;  %733 = vmatprep.subr.msk.bf16.mxu0 %vm258_vm1, %v731_v8  ;;  %v461_v11 = vsel %vm258_vm1, %v730_v9, 0 }
  0xce   : > { %478 = vmatpush1.bf16.msra.mxu0 %v461_v11  ;;  %757 = vmatpush3.bf16.msra.mxu1 %v828_v10 }
  0xcf   : > { %758 = vmatprep.subr.bf16.mxu1 %v933_v2 }
  0xd1   : > { %v829_v13 = vld [vmem:[#allocation2 + $0x68] ss:$0 sps:$4 sm:$0xff]   ;;  %734 = vmatmul.mubr.msk.bf16.vlgmr.msra.gmra.mrb[0].mxu0 %vm455_vm10, %v242_v12 }
  0xd2   : > { %v467_v14 = vsel %vm258_vm1, %v829_v13, 0 }
  0xd3   : > { %759 = vmatpush3.bf16.msra.mxu1 %v467_v14 }
  0xd6   : > { %761 = vmatmul.mubr.msk.bf16.vlgmr.msra.gmra.mrb[0].mxu1 %vm455_vm10, %v242_v12 }
 0x1a4   : > { %v503_v23 = vpop.f32.mrb[0].mxu0 }
 0x1a5   : > { %v566_v24 = vmul.f32 %v554_v20, %v503_v23  ;;  %v505_v2 = vpop.f32.mrb[1].mxu0 }
 0x1a6   : > { %v567_v25 = vmul.f32 %v558_v21, %v505_v2  ;;  %v507_v26 = vpop.f32.mrb[2].mxu0 }
 0x1a7   : > { %v508_v28 = vpop.f32.mrb[3].mxu0 }
 0x1a8   : > { %v569_v29 = vadd.f32 %v567_v25, %v566_v24 }
 0x1a9   : > { %v544_v30 = vpop.f32.mrb[0].mxu1 }
 0x1aa   : > { %v568_v31 = vmul.f32 %v562_v27, %v544_v30  ;;  %v762_v32 = vpop.f32.mrb[1].mxu1 }
 0x1ab   : > { %v547_v33 = vpop.f32.mrb[2].mxu1 }
 0x1ac   : > { %v763_v34 = vpop.f32.mrb[3].mxu1  ;;  %v570_v35 = vadd.f32 %v569_v29, %v568_v31 }
 0x1ae   : > { %571 = vadd.xlane.f32.xlu0 %v570_v35 }
 0x23b   : > { %v572_v36 = vpop.xlane.xlu0 %571 }
 0x23c   : > { %v573_v37 = vmul.f32 0.00390625, %v572_v36 }
 0x23e   : > { %v574_v38 = vsub.f32 %v566_v24, %v573_v37  ;;  %v575_v39 = vsub.f32 %v567_v25, %v573_v37  ;;  %v576_v40 = vsub.f32 %v568_v31, %v573_v37 }
 0x240   : > { %v577_v41 = vmul.f32 %v574_v38, %v554_v20  ;;  %v578_v42 = vmul.f32 %v575_v39, %v558_v21  ;;  %v579_v43 = vmul.f32 %v576_v40, %v562_v27 }
 0x242   : > { %v580_v44 = vmul.f32 %v577_v41, %v577_v41  ;;  %v581_v45 = vmul.f32 %v578_v42, %v578_v42  ;;  %v582_v46 = vmul.f32 %v579_v43, %v579_v43 }
 0x244   : > { %v583_v47 = vadd.f32 %v581_v45, %v580_v44 }
 0x246   : > { %v584_v48 = vadd.f32 %v583_v47, %v582_v46 }
 0x248   : > { %585 = vadd.xlane.f32.xlu1 %v584_v48 }
 0x259   : > { %601 = vperm.xlu1 %824, %v244_v49  }
 0x2d5   : > { %v586_v50 = vpop.xlane.xlu1 %585 }
 0x2d6   : > { %v587_v51 = vmul.f32 0.00390625, %v586_v50 }
 0x2d8   : > { %v588_v52 = vadd.f32 1e-05, %v587_v51 }
 0x2d9   : > { %v602_v57 = vpop.permute.xlu1 %601 }
 0x2da   : > { %830 = vrsqrt.f32 %v588_v52 }
 0x2e4   : > { %v831_v54 = vpop.eup %830 }
 0x2e5   : > { %v590_v55 = vmul.f32 %v831_v54, %v243_v53 }
 0x2e7   : > { %593 = vperm.xlu0 %823, %v590_v55  }
 0x366   : > { %v594_v56 = vpop.permute.xlu0 %593 }
 0x367   : > { %v596_v58 = vmul.f32 %v594_v56, %v577_v41  ;;  %v597_v59 = vmul.f32 %v594_v56, %v578_v42  ;;  %v598_v60 = vmul.f32 %v594_v56, %v579_v43 }
 0x369   : > { %v604_v61 = vadd.f32 %v602_v57, %v596_v58  ;;  %v605_v62 = vadd.f32 %v602_v57, %v597_v59  ;;  %v606_v63 = vadd.f32 %v602_v57, %v598_v60 }
 0x36b   : > { %v607_v0 = vmax.f32 %v604_v61, 0.0  ;;  %v608_v1 = vmax.f32 %v605_v62, 0.0  ;;  %v609_v3 = vmax.f32 %v606_v63, 0.0 }
 0x36d   : > { %v742_v4 = vpack.c.bf16 %v608_v1, %v607_v0  ;;  %v743_v5 = vpack.c.bf16 %v609_v3, %v609_v3 }
 0x36f   : > { %624 = vst [vmem:[%s240_s29 + $0x8] sm:$0xf] %v743_v5  ;;  %623 = vst [vmem:[%s240_s29] sm:$0xff] %v742_v4 }
 0x370   : > { %875 = shalt.err (!%p872_p4)
}
 0x371   : > { %s876_s13 = scalar_lea.hbm %s1132_s8, 192  ;;  %s880_s25 = scalar_lea.hbm %s1181_s5, 384 }
 0x372   : > { %p877_p5 = scmp.ne.s32.totalorder %s1132_s8, %s876_s13  ;;  %p881_p0 = scmp.lt.u32.totalorder %s1132_s8, %s1181_s5 }
 0x373   : > { %p882_p1 = scmp.lt.u32.totalorder %s880_s25, %s876_s13  ;;  %p884_p6 = scmp.lt.u32.totalorder %s876_s13, %s1132_s8 }
 0x374   : > { %p878_p8 = pnand %p877_p5, %p1190_p11 }
 0x375   : > { %p883_p3 = por %p882_p1, %p881_p0 }
 0x376   : > { %p879_p9 = pneg %p878_p8 }
 0x377   : > { %p885_p12 = por %p884_p6, %p883_p3 }
 0x379   : > { %p886_p13 = pnand %p885_p12, %p879_p9 }
 0x37b   : > { %889 = shalt.err (!%p886_p13)
}
 0x37c   : > { %768 = dma.vmem_to_hbm [thread:$0]  (%p1190_p11), %s1134_s16, 192, %s1132_s8, %s626_s22  }
 0x37d PF: > { %s652_s15 = sand.u32 1, %s916_s18   ;;  %p1191_p7 = scmp.ne.s32.totalorder %s1186_s6, 0 }
 0x37e   : > { %p1192_p10 = scmp.ge.s32.totalorder %s928_s21, 2  ;;  %s653_s29 = scalar_lea.sflag [#allocation5], %s652_s15 }
 0x380   : > { %p775_p2 = pnand %p1192_p10, %p1191_p7 }
 0x382   : > { %911 = dma.done.wait (!%p775_p2), %s653_s29, 192  }
 0x383   : > { %913 = vsyncadd (!%p775_p2), %s653_s29, 4294967104  ;;  %p18_p4 = scmp.ge.s32.totalorder %s998_s24, 4   ;;  %s1193_s18 = smov %s920_s19 }
 0x384   : > { %s1194_s19 = smov %s924_s20  ;;  %s1195_s20 = smov %s1010_s27 }
 0x385   : > { %s1196_s21 = smov %s998_s24  ;;  %20 = sbr.rel (!%p18_p4) target bundleno = 5 (0x5), region = 85 }
 0x38c   :  { %658 = vsyncpa [#allocation4], 1 }
 0x38d   :  { %660 = vsyncpa [#allocation4 + $0x1], 1 }
 0x38e   :  { %661 = vsyncpa [#allocation5], 1 }
 0x38f   :  { %663 = vsyncpa [#allocation5 + $0x1], 1 }

</bundles_post_ra>
